<compile_context>
chip_gen: v7x
topology: tpu7x:2x2x1
jax: 0.10.0
libtpu: 0.0.40
codegen_flags: <defaults>
</compile_context>

<pallas_src>
import jax
import jax.numpy as jnp
from jax.experimental import pallas as pl
from jax.experimental.pallas import tpu as pltpu  # noqa: F401  (TPU backend)

# ---- model hyperparameters (small, consistent with the module's __init__) ----
B = 2            # batch
L = 8            # max sequence length
WORD_DIM = 32    # args.word_dim
D_E = 32         # args.d_e
CLASS_SIZE = 3   # args.class_size (NLI: entail / neutral / contradict)
VOCAB = 50       # args.word_vocab_size
LN_EPS = 1e-5    # nn.LayerNorm default eps

B_PAD = 8        # pad batch rows to a full sublane group
VPAD = 128       # pad vocab to a full lane group (one-hot gather matmul)
OUT_LANES = 128  # pad class dim to a full lane group (lane-dense store)


def _full_spec(shape):
    # whole-array block (block_shape == array shape satisfies TPU tiling rules)
    return pl.BlockSpec(shape, lambda: (0,) * len(shape))


# ---------------------------------------------------------------------------
# Fused kernel: embedding gather + masked mean pool + encoder projection for
# premise and hypothesis (stacked on the batch axis), then classifier head.
#
#   ids  : [2*B_PAD, L, 1] int32   (rows 0..7 premise, 8..15 hypothesis;
#                                   pad rows are 0 / len 0)
#   lens : [2*B_PAD, 1, 1] int32
#   A[b,v] = sum_l 1[l < len_b] * 1[ids[b,l]==v] / len_b        (scaled one-hot)
#   pooled = A @ emb_pad                                        == mean-pool
#   sen    = pooled @ w_enc + b_enc                              (encoder stand-in)
#   z      = p@W0 + h@W1 + |p-h|@W2 + (p*h)@W3 + b_fc            == cat(...)@w_fc
#   out    = relu(LayerNorm(z)) @ w_out_pad + b_out_pad          [8, 128]
# ---------------------------------------------------------------------------
def nli_fused_kernel(ids_ref, len_ref, emb_ref, w_enc_ref, b_enc_ref,
                     wfc_ref, b_fc_ref, g_ref, beta_ref, wo_ref, bo_ref,
                     o_ref):
    ids = ids_ref[...]                                   # [16, 8, 1] int32
    lens = len_ref[...]                                  # [16, 1, 1] int32
    inv_len = 1.0 / jnp.maximum(lens.astype(jnp.float32), 1.0)   # [16,1,1]

    # scaled one-hot gather weights; L stays on the sublane axis throughout.
    v_iota = jax.lax.broadcasted_iota(jnp.int32, (2 * B_PAD, L, VPAD), 2)
    l_iota = jax.lax.broadcasted_iota(jnp.int32, (2 * B_PAD, L, VPAD), 1)
    hit = (v_iota == ids) & (l_iota < lens)              # [16, 8, 128] bool
    A = jnp.sum(jnp.where(hit, inv_len, 0.0), axis=1)    # [16, 128]

    # gather + mean-pool as one MXU matmul, then encoder projection.
    pooled = jnp.dot(A, emb_ref[...],
                     preferred_element_type=jnp.float32)          # [16, 32]
    sen = (jnp.dot(pooled, w_enc_ref[...],
                   preferred_element_type=jnp.float32)
           + b_enc_ref[...])                                      # [16, 128]

    p = sen[0:B_PAD, :]                                  # [8, 128]
    h = sen[B_PAD:2 * B_PAD, :]                          # [8, 128]
    d = jnp.abs(p - h)
    ph = p * h

    # fc as 4 accumulated matmuls against the [4,128,32] block weight
    # (no 512-lane concat inside the kernel).
    z = (jnp.dot(p,  wfc_ref[0], preferred_element_type=jnp.float32)
         + jnp.dot(h,  wfc_ref[1], preferred_element_type=jnp.float32)
         + jnp.dot(d,  wfc_ref[2], preferred_element_type=jnp.float32)
         + jnp.dot(ph, wfc_ref[3], preferred_element_type=jnp.float32)
         + b_fc_ref[...])                                # [8, d_e]

    # LayerNorm(d_e)   (dropout == identity at inference)
    mu = jnp.mean(z, axis=-1, keepdims=True)
    var = jnp.mean((z - mu) ** 2, axis=-1, keepdims=True)
    zn = (z - mu) * jax.lax.rsqrt(var + LN_EPS)
    zn = zn * g_ref[...] + beta_ref[...]
    a = jnp.maximum(zn, 0.0)                             # ReLU

    # fc_out with class dim padded to 128 lanes -> full unmasked store.
    o_ref[...] = (jnp.dot(a, wo_ref[...], preferred_element_type=jnp.float32)
                  + bo_ref[...])                         # [8, 128]


def nli_fused(ids3, len3, emb_pad, w_enc, b_enc, wfc_blocks, b_fc,
              ln_g, ln_b, w_out_p, b_out_p):
    args = (ids3, len3, emb_pad, w_enc, b_enc, wfc_blocks, b_fc,
            ln_g, ln_b, w_out_p, b_out_p)
    return pl.pallas_call(
        nli_fused_kernel,
        out_shape=jax.ShapeDtypeStruct((B_PAD, OUT_LANES), jnp.float32),
        in_specs=[_full_spec(a.shape) for a in args],
        out_specs=_full_spec((B_PAD, OUT_LANES)),
    )(*args)


# ---------------------------------------------------------------------------
# Glue (plain JAX): only tiny int32 scatter/pad of ids and lengths; the
# embedding lookup, mask, pooling and all f32 work happen inside the kernel.
# ---------------------------------------------------------------------------
def nli_forward(params, premise, pre_len, hypothesis, hypo_len):
    bp = premise.shape[0]
    ids = jnp.zeros((2 * B_PAD, L), jnp.int32)
    ids = ids.at[0:bp, :].set(premise.astype(jnp.int32))
    ids = ids.at[B_PAD:B_PAD + bp, :].set(hypothesis.astype(jnp.int32))
    lens = jnp.zeros((2 * B_PAD,), jnp.int32)
    lens = lens.at[0:bp].set(pre_len.astype(jnp.int32))
    lens = lens.at[B_PAD:B_PAD + bp].set(hypo_len.astype(jnp.int32))

    logits_pad = nli_fused(
        ids.reshape(2 * B_PAD, L, 1),
        lens.reshape(2 * B_PAD, 1, 1),
        params["emb_pad"], params["w_enc"], params["b_enc"],
        params["wfc_blocks"], params["b_fc"],
        params["ln_g"], params["ln_b"],
        params["w_out_pad"], params["b_out_pad"],
    )
    return logits_pad[:bp, :CLASS_SIZE]


def init_params(key):
    keys = jax.random.split(key, 6)
    # frozen embedding table; row 0 ~ U(-0.05, 0.05) as in the PyTorch init
    word_emb = jax.random.normal(keys[0], (VOCAB, WORD_DIM), jnp.float32) * 0.1
    row0 = jax.random.uniform(keys[1], (WORD_DIM,), jnp.float32, -0.05, 0.05)
    word_emb = word_emb.at[0].set(row0)
    emb_pad = jnp.pad(word_emb, ((0, VPAD - VOCAB), (0, 0)))      # [128, 32]

    # fc: 16*d_e -> d_e, stored [in, out]; split once into the four K blocks
    # matching cat([p, h, |p-h|, p*h]).
    # NOTE: real torch nn.Linear weights are [out, in] -> transpose before
    #       this reshape when importing trained weights.
    w_fc = jax.random.normal(keys[3], (16 * D_E, D_E), jnp.float32) * 0.05
    wfc_blocks = w_fc.reshape(4, 4 * D_E, D_E)                    # [4, 128, 32]

    # fc_out: d_e -> class_size, padded once to 128 output lanes.
    w_out = jax.random.normal(keys[4], (D_E, CLASS_SIZE), jnp.float32) * 0.05
    w_out_pad = jnp.pad(w_out, ((0, 0), (0, OUT_LANES - CLASS_SIZE)))
    b_out_pad = jnp.zeros((1, OUT_LANES), jnp.float32)

    return {
        "emb_pad": emb_pad,
        # encoder stand-in projection: Dw -> 4*d_e
        "w_enc": jax.random.normal(keys[2], (WORD_DIM, 4 * D_E), jnp.float32) * 0.05,
        "b_enc": jnp.zeros((1, 4 * D_E), jnp.float32),
        "wfc_blocks": wfc_blocks,
        "b_fc": jnp.zeros((1, D_E), jnp.float32),
        # LayerNorm(d_e) default init
        "ln_g": jnp.ones((1, D_E), jnp.float32),
        "ln_b": jnp.zeros((1, D_E), jnp.float32),
        "w_out_pad": w_out_pad,
        "b_out_pad": b_out_pad,
    }


if __name__ == "__main__":
    params = init_params(jax.random.PRNGKey(0))

    k1, k2 = jax.random.split(jax.random.PRNGKey(0), 2)
    premise = jax.random.randint(k1, (B, L), 0, VOCAB, dtype=jnp.int32)
    hypothesis = jax.random.randint(k2, (B, L), 0, VOCAB, dtype=jnp.int32)
    pre_len = jnp.array([L, L - 3], dtype=jnp.int32)
    hypo_len = jnp.array([L - 2, L], dtype=jnp.int32)

    fwd = jax.jit(nli_forward)
    logits = fwd(params, premise, pre_len, hypothesis, hypo_len)
    jax.block_until_ready(logits)
    assert logits.shape == (B, CLASS_SIZE)
    print("KERNEL_OK")
</pallas_src>

<mosaic_0001>
module attributes {stable_mosaic.version = 11 : i64} {
  func.func @nli_fused_kernel(%arg0: memref<16x8x1xi32, #tpu.memory_space<vmem>>, %arg1: memref<16x1x1xi32, #tpu.memory_space<vmem>>, %arg2: memref<128x32xf32, #tpu.memory_space<vmem>>, %arg3: memref<32x128xf32, #tpu.memory_space<vmem>>, %arg4: memref<1x128xf32, #tpu.memory_space<vmem>>, %arg5: memref<4x128x32xf32, #tpu.memory_space<vmem>>, %arg6: memref<1x32xf32, #tpu.memory_space<vmem>>, %arg7: memref<1x32xf32, #tpu.memory_space<vmem>>, %arg8: memref<1x32xf32, #tpu.memory_space<vmem>>, %arg9: memref<32x128xf32, #tpu.memory_space<vmem>>, %arg10: memref<1x128xf32, #tpu.memory_space<vmem>>, %arg11: memref<8x128xf32, #tpu.memory_space<vmem>>) attributes {dimension_semantics = [], scalar_prefetch = 0 : i64, scratch_operands = 0 : i64, tpu.core_type = #tpu.core_type<tc>} {
    %c0 = arith.constant 0 : index
    %c0_0 = arith.constant 0 : index
    %c0_1 = arith.constant 0 : index
    %0 = vector.load %arg0[%c0, %c0_0, %c0_1] : memref<16x8x1xi32, #tpu.memory_space<vmem>>, vector<16x8x1xi32>
    %c0_2 = arith.constant 0 : index
    %c0_3 = arith.constant 0 : index
    %c0_4 = arith.constant 0 : index
    %1 = vector.load %arg1[%c0_2, %c0_3, %c0_4] : memref<16x1x1xi32, #tpu.memory_space<vmem>>, vector<16x1x1xi32>
    %2 = arith.sitofp %1 : vector<16x1x1xi32> to vector<16x1x1xf32>
    %cst = arith.constant 1.000000e+00 : f32
    %3 = vector.broadcast %cst : f32 to vector<16x1x1xf32>
    %4 = arith.maximumf %2, %3 : vector<16x1x1xf32>
    %cst_5 = arith.constant 1.000000e+00 : f32
    %5 = vector.broadcast %cst_5 : f32 to vector<16x1x1xf32>
    %6 = arith.divf %5, %4 : vector<16x1x1xf32>
    %7 = tpu.iota {dimensions = array<i32: 2>} : vector<16x8x128xi32>
    %8 = tpu.iota {dimensions = array<i32: 1>} : vector<16x8x128xi32>
    %9 = vector.broadcast %0 : vector<16x8x1xi32> to vector<16x8x128xi32>
    %10 = arith.cmpi eq, %7, %9 : vector<16x8x128xi32>
    %11 = vector.broadcast %1 : vector<16x1x1xi32> to vector<16x8x128xi32>
    %12 = arith.cmpi slt, %8, %11 : vector<16x8x128xi32>
    %13 = arith.andi %10, %12 : vector<16x8x128xi1>
    %cst_6 = arith.constant 0.000000e+00 : f32
    %14 = vector.shape_cast %6 : vector<16x1x1xf32> to vector<16x1x1xf32>
    %15 = vector.broadcast %14 : vector<16x1x1xf32> to vector<16x8x128xf32>
    %16 = vector.broadcast %cst_6 : f32 to vector<16x8x128xf32>
    %17 = arith.select %13, %15, %16 : vector<16x8x128xi1>, vector<16x8x128xf32>
    %cst_7 = arith.constant dense<0.000000e+00> : vector<16x128xf32>
    %18 = vector.multi_reduction <add>, %17, %cst_7 [1] : vector<16x8x128xf32> to vector<16x128xf32>
    %c0_8 = arith.constant 0 : index
    %c0_9 = arith.constant 0 : index
    %19 = vector.load %arg2[%c0_8, %c0_9] : memref<128x32xf32, #tpu.memory_space<vmem>>, vector<128x32xf32>
    %cst_10 = arith.constant dense<0.000000e+00> : vector<16x32xf32>
    %20 = tpu.matmul %18, %19, %cst_10 {dimension_numbers = #tpu.dot_dimension_numbers<[1], [0], [0], [1], [0, 0, 1, 1], [], []>} : vector<16x128xf32>, vector<128x32xf32>, vector<16x32xf32> -> vector<16x32xf32>
    %c0_11 = arith.constant 0 : index
    %c0_12 = arith.constant 0 : index
    %21 = vector.load %arg3[%c0_11, %c0_12] : memref<32x128xf32, #tpu.memory_space<vmem>>, vector<32x128xf32>
    %cst_13 = arith.constant dense<0.000000e+00> : vector<16x128xf32>
    %22 = tpu.matmul %20, %21, %cst_13 {dimension_numbers = #tpu.dot_dimension_numbers<[1], [0], [0], [1], [0, 0, 1, 1], [], []>} : vector<16x32xf32>, vector<32x128xf32>, vector<16x128xf32> -> vector<16x128xf32>
    %c0_14 = arith.constant 0 : index
    %c0_15 = arith.constant 0 : index
    %23 = vector.load %arg4[%c0_14, %c0_15] : memref<1x128xf32, #tpu.memory_space<vmem>>, vector<1x128xf32>
    %24 = vector.broadcast %23 : vector<1x128xf32> to vector<16x128xf32>
    %25 = arith.addf %22, %24 : vector<16x128xf32>
    %26 = vector.extract_strided_slice %25 {offsets = [0, 0], sizes = [8, 128], strides = [1, 1]} : vector<16x128xf32> to vector<8x128xf32>
    %27 = vector.extract_strided_slice %25 {offsets = [8, 0], sizes = [8, 128], strides = [1, 1]} : vector<16x128xf32> to vector<8x128xf32>
    %28 = arith.subf %26, %27 : vector<8x128xf32>
    %29 = math.absf %28 : vector<8x128xf32>
    %30 = arith.mulf %26, %27 : vector<8x128xf32>
    %c0_16 = arith.constant 0 : index
    %c0_17 = arith.constant 0 : index
    %c0_18 = arith.constant 0 : index
    %31 = vector.load %arg5[%c0_16, %c0_17, %c0_18] : memref<4x128x32xf32, #tpu.memory_space<vmem>>, vector<1x128x32xf32>
    %32 = vector.shape_cast %31 : vector<1x128x32xf32> to vector<128x32xf32>
    %cst_19 = arith.constant dense<0.000000e+00> : vector<8x32xf32>
    %33 = tpu.matmul %26, %32, %cst_19 {dimension_numbers = #tpu.dot_dimension_numbers<[1], [0], [0], [1], [0, 0, 1, 1], [], []>} : vector<8x128xf32>, vector<128x32xf32>, vector<8x32xf32> -> vector<8x32xf32>
    %c1 = arith.constant 1 : index
    %c0_20 = arith.constant 0 : index
    %c0_21 = arith.constant 0 : index
    %34 = vector.load %arg5[%c1, %c0_20, %c0_21] : memref<4x128x32xf32, #tpu.memory_space<vmem>>, vector<1x128x32xf32>
    %35 = vector.shape_cast %34 : vector<1x128x32xf32> to vector<128x32xf32>
    %cst_22 = arith.constant dense<0.000000e+00> : vector<8x32xf32>
    %36 = tpu.matmul %27, %35, %cst_22 {dimension_numbers = #tpu.dot_dimension_numbers<[1], [0], [0], [1], [0, 0, 1, 1], [], []>} : vector<8x128xf32>, vector<128x32xf32>, vector<8x32xf32> -> vector<8x32xf32>
    %37 = arith.addf %33, %36 : vector<8x32xf32>
    %c2 = arith.constant 2 : index
    %c0_23 = arith.constant 0 : index
    %c0_24 = arith.constant 0 : index
    %38 = vector.load %arg5[%c2, %c0_23, %c0_24] : memref<4x128x32xf32, #tpu.memory_space<vmem>>, vector<1x128x32xf32>
    %39 = vector.shape_cast %38 : vector<1x128x32xf32> to vector<128x32xf32>
    %cst_25 = arith.constant dense<0.000000e+00> : vector<8x32xf32>
    %40 = tpu.matmul %29, %39, %cst_25 {dimension_numbers = #tpu.dot_dimension_numbers<[1], [0], [0], [1], [0, 0, 1, 1], [], []>} : vector<8x128xf32>, vector<128x32xf32>, vector<8x32xf32> -> vector<8x32xf32>
    %41 = arith.addf %37, %40 : vector<8x32xf32>
    %c3 = arith.constant 3 : index
    %c0_26 = arith.constant 0 : index
    %c0_27 = arith.constant 0 : index
    %42 = vector.load %arg5[%c3, %c0_26, %c0_27] : memref<4x128x32xf32, #tpu.memory_space<vmem>>, vector<1x128x32xf32>
    %43 = vector.shape_cast %42 : vector<1x128x32xf32> to vector<128x32xf32>
    %cst_28 = arith.constant dense<0.000000e+00> : vector<8x32xf32>
    %44 = tpu.matmul %30, %43, %cst_28 {dimension_numbers = #tpu.dot_dimension_numbers<[1], [0], [0], [1], [0, 0, 1, 1], [], []>} : vector<8x128xf32>, vector<128x32xf32>, vector<8x32xf32> -> vector<8x32xf32>
    %45 = arith.addf %41, %44 : vector<8x32xf32>
    %c0_29 = arith.constant 0 : index
    %c0_30 = arith.constant 0 : index
    %46 = vector.load %arg6[%c0_29, %c0_30] : memref<1x32xf32, #tpu.memory_space<vmem>>, vector<1x32xf32>
    %47 = vector.broadcast %46 : vector<1x32xf32> to vector<8x32xf32>
    %48 = arith.addf %45, %47 : vector<8x32xf32>
    %cst_31 = arith.constant dense<0.000000e+00> : vector<8xf32>
    %49 = vector.multi_reduction <add>, %48, %cst_31 [1] : vector<8x32xf32> to vector<8xf32>
    %50 = vector.shape_cast %49 : vector<8xf32> to vector<8x1xf32>
    %cst_32 = arith.constant 3.200000e+01 : f32
    %51 = vector.broadcast %cst_32 : f32 to vector<8x1xf32>
    %52 = arith.divf %50, %51 : vector<8x1xf32>
    %53 = vector.broadcast %52 : vector<8x1xf32> to vector<8x32xf32>
    %54 = arith.subf %48, %53 : vector<8x32xf32>
    %55 = arith.mulf %54, %54 : vector<8x32xf32>
    %cst_33 = arith.constant dense<0.000000e+00> : vector<8xf32>
    %56 = vector.multi_reduction <add>, %55, %cst_33 [1] : vector<8x32xf32> to vector<8xf32>
    %57 = vector.shape_cast %56 : vector<8xf32> to vector<8x1xf32>
    %cst_34 = arith.constant 3.200000e+01 : f32
    %58 = vector.broadcast %cst_34 : f32 to vector<8x1xf32>
    %59 = arith.divf %57, %58 : vector<8x1xf32>
    %60 = vector.broadcast %52 : vector<8x1xf32> to vector<8x32xf32>
    %61 = arith.subf %48, %60 : vector<8x32xf32>
    %cst_35 = arith.constant 9.99999974E-6 : f32
    %62 = vector.broadcast %cst_35 : f32 to vector<8x1xf32>
    %63 = arith.addf %59, %62 : vector<8x1xf32>
    %64 = math.rsqrt %63 : vector<8x1xf32>
    %65 = vector.broadcast %64 : vector<8x1xf32> to vector<8x32xf32>
    %66 = arith.mulf %61, %65 : vector<8x32xf32>
    %c0_36 = arith.constant 0 : index
    %c0_37 = arith.constant 0 : index
    %67 = vector.load %arg7[%c0_36, %c0_37] : memref<1x32xf32, #tpu.memory_space<vmem>>, vector<1x32xf32>
    %68 = vector.broadcast %67 : vector<1x32xf32> to vector<8x32xf32>
    %69 = arith.mulf %66, %68 : vector<8x32xf32>
    %c0_38 = arith.constant 0 : index
    %c0_39 = arith.constant 0 : index
    %70 = vector.load %arg8[%c0_38, %c0_39] : memref<1x32xf32, #tpu.memory_space<vmem>>, vector<1x32xf32>
    %71 = vector.broadcast %70 : vector<1x32xf32> to vector<8x32xf32>
    %72 = arith.addf %69, %71 : vector<8x32xf32>
    %cst_40 = arith.constant 0.000000e+00 : f32
    %73 = vector.broadcast %cst_40 : f32 to vector<8x32xf32>
    %74 = arith.maximumf %72, %73 : vector<8x32xf32>
    %c0_41 = arith.constant 0 : index
    %c0_42 = arith.constant 0 : index
    %75 = vector.load %arg9[%c0_41, %c0_42] : memref<32x128xf32, #tpu.memory_space<vmem>>, vector<32x128xf32>
    %cst_43 = arith.constant dense<0.000000e+00> : vector<8x128xf32>
    %76 = tpu.matmul %74, %75, %cst_43 {dimension_numbers = #tpu.dot_dimension_numbers<[1], [0], [0], [1], [0, 0, 1, 1], [], []>} : vector<8x32xf32>, vector<32x128xf32>, vector<8x128xf32> -> vector<8x128xf32>
    %c0_44 = arith.constant 0 : index
    %c0_45 = arith.constant 0 : index
    %77 = vector.load %arg10[%c0_44, %c0_45] : memref<1x128xf32, #tpu.memory_space<vmem>>, vector<1x128xf32>
    %78 = vector.broadcast %77 : vector<1x128xf32> to vector<8x128xf32>
    %79 = arith.addf %76, %78 : vector<8x128xf32>
    %c0_46 = arith.constant 0 : index
    %c0_47 = arith.constant 0 : index
    %80 = vector.load %arg11[%c0_46, %c0_47] : memref<8x128xf32, #tpu.memory_space<vmem>>, vector<8x128xf32>
    tpu.vector_store %arg11[%c0_46, %c0_47], %79 {strides = array<i32>} : memref<8x128xf32, #tpu.memory_space<vmem>>, vector<8x128xf32>,
    return
  }
}

</mosaic_0001>

<bundles_post_ra>
// kernel: nli_forward.1
= control target key start
LH: loop header
LB: loop body
LE: loop exit
PB: predicated region body
PF: predicated region fallthrough
CT: control target
= control target key end

     0   :  { %v134_v0 = vlaneseq  ;;  %v1837_v1 = vmov 0   ;;  %s2545_s0 = inlined_call_operand.vmem [shape: s32[16,8,1], index: 0, kind: input, shape index: {}]   ;;  %s2546_s1 = inlined_call_operand.vmem [shape: s32[16,1,1], index: 1, kind: input, shape index: {}]   ;;  %s2547_s2 = inlined_call_operand.vmem [shape: f32[128,32], index: 2, kind: input, shape index: {}]   ;;  %s2548_s3 = inlined_call_operand.vmem [shape: f32[32,128], index: 3, kind: input, shape index: {}]   ;;  %s2549_s5 = inlined_call_operand.vmem [shape: f32[4,128,32], index: 5, kind: input, shape index: {}]   ;;  %s2550_s4 = inlined_call_operand.vmem [shape: f32[1,128], index: 4, kind: input, shape index: {}]   ;;  %s2551_s6 = inlined_call_operand.vmem [shape: f32[1,32], index: 6, kind: input, shape index: {}]   ;;  %s2552_s9 = inlined_call_operand.vmem [shape: f32[32,128], index: 9, kind: input, shape index: {}]   ;;  %s2553_s7 = inlined_call_operand.vmem [shape: f32[1,32], index: 7, kind: input, shape index: {}]   ;;  %s2554_s8 = inlined_call_operand.vmem [shape: f32[1,32], index: 8, kind: input, shape index: {}]   ;;  %s2555_s10 = inlined_call_operand.vmem [shape: f32[1,128], index: 10, kind: input, shape index: {}]   ;;  %s2556_s11 = inlined_call_operand.vmem [shape: f32[8,128], index: 11, kind: output, shape index: {}]  }
   0x1   :  { %1801 = vset.pattern.permute.xlu0 %v1837_v1  ;;  %v38_v2 = vld [vmem:[%s2545_s0] sm:$0xff]  ;;  %1802 = vset.pattern.permute.xlu1 %v1837_v1  ;;  %v39_v5 = vld [vmem:[%s2545_s0 + $0x8] sm:$0xff]  ;;  %v40_v11 = vld [vmem:[%s2545_s0 + $0x10] sm:$0xff] }
   0x2   :  { %v46_v3 = vld [vmem:[%s2545_s0 + $0x40] sm:$0xff]  ;;  %139 = vperm.xlu0 %1801, %v38_v2   ;;  %v1908_v4 = vshrl.u32 %v134_v0, 7  ;;  %v47_v17 = vld [vmem:[%s2545_s0 + $0x48] sm:$0xff]  ;;  %v41_v35 = vld [vmem:[%s2545_s0 + $0x18] sm:$0xff] }
   0x3   :  { %163 = vperm.xlu1 %1802, %v46_v3   ;;  %v54_v6 = vld [vmem:[%s2546_s1] sm:$0x1]  ;;  %v55_v9 = vld [vmem:[%s2546_s1 + $0x1] sm:$0x1]  ;;  %v56_v15 = vld [vmem:[%s2546_s1 + $0x2] sm:$0x1] }
   0x4   :  { %v1917_v7 = vsub.s32 0, %v1908_v4  ;;  %v70_v8 = vcvt.s32.f32 %v54_v6  ;;  %v71_v12 = vcvt.s32.f32 %v55_v9  ;;  %v62_v18 = vld [vmem:[%s2546_s1 + $0x8] sm:$0x1]  ;;  %v63_v20 = vld [vmem:[%s2546_s1 + $0x9] sm:$0x1]  ;;  %v72_v28 = vcvt.s32.f32 %v56_v15  ;;  %v48_v41 = vld [vmem:[%s2545_s0 + $0x50] sm:$0xff] }
   0x5   :  { %v1943_v21 = vld [vmem:[%s2546_s1 + $0x7] sm:$0x1]  ;;  %v1949_v23 = vld [vmem:[%s2546_s1 + $0xe] sm:$0x1]  ;;  %v1954_v24 = vld [vmem:[%s2546_s1 + $0xf] sm:$0x1]  ;;  %v78_v34 = vcvt.s32.f32 %v62_v18  ;;  %v79_v40 = vcvt.s32.f32 %v63_v20 }
   0x6   :  { %142 = vperm.xlu0 %1801, %v39_v5   ;;  %v205_v10 = vrot.slane %v54_v6, %v1917_v7  ;;  %v209_v13 = vrot.slane %v55_v9, %v1917_v7  ;;  %v86_v14 = vmax.f32 %v70_v8, 1.0  ;;  %v87_v16 = vmax.f32 %v71_v12, 1.0  ;;  %v57_v36 = vld [vmem:[%s2546_s1 + $0x3] sm:$0x1]  ;;  %v64_v42 = vld [vmem:[%s2546_s1 + $0xa] sm:$0x1] }
   0x7   :  { %v213_v19 = vrot.slane %v56_v15, %v1917_v7  ;;  %v237_v22 = vrot.slane %v62_v18, %v1917_v7  ;;  %v241_v25 = vrot.slane %v63_v20, %v1917_v7  ;;  %v77_v26 = vcvt.s32.f32 %v1943_v21  ;;  %v42_v54 = vld [vmem:[%s2545_s0 + $0x20] sm:$0xff]  ;;  %v49_v60 = vld [vmem:[%s2545_s0 + $0x58] sm:$0xff]  ;;  %v65_v61 = vld [vmem:[%s2546_s1 + $0xb] sm:$0x1] }
   0x8   :  { %267 = vperm.xlu1 %1802, %v205_v10   ;;  %1803 = vrcp.f32 %v86_v14  ;;  %v233_v27 = vrot.slane %v1943_v21, %v1917_v7  ;;  %v84_v29 = vcvt.s32.f32 %v1949_v23  ;;  %v261_v30 = vrot.slane %v1949_v23, %v1917_v7  ;;  %v58_v55 = vld [vmem:[%s2546_s1 + $0x4] sm:$0x1]  ;;  %v43_v14 = vld [vmem:[%s2545_s0 + $0x28] sm:$0xff]  ;;  %v59_v15 = vld [vmem:[%s2546_s1 + $0x5] sm:$0x1] }
   0x9   :  { %1805 = vrcp.f32 %v87_v16  ;;  %v85_v31 = vcvt.s32.f32 %v1954_v24  ;;  %v93_v32 = vmax.f32 %v77_v26, 1.0  ;;  %v265_v33 = vrot.slane %v1954_v24, %v1917_v7  ;;  %v66_v18 = vld [vmem:[%s2546_s1 + $0xc] sm:$0x1]  ;;  %v605_v21 = vld [vmem:[%s2547_s2 + $0x18] sm:$0xff]  ;;  %v610_v24 = vld [vmem:[%s2547_s2 + $0x40] sm:$0xff] }
   0xa   :  { %145 = vperm.xlu0 %1801, %v40_v11   ;;  %v100_v37 = vmax.f32 %v84_v29, 1.0  ;;  %v88_v39 = vmax.f32 %v72_v28, 1.0  ;;  %v217_v43 = vrot.slane %v57_v36, %v1917_v7  ;;  %v94_v45 = vmax.f32 %v78_v34, 1.0  ;;  %v44_v34 = vld [vmem:[%s2545_s0 + $0x30] sm:$0xff]  ;;  %v53_v23 = vld [vmem:[%s2545_s0 + $0x78] sm:$0xff] }
   0xb   :  { %v101_v38 = vmax.f32 %v85_v31, 1.0  ;;  %1807 = vrcp.f32 %v93_v32  ;;  %v245_v46 = vrot.slane %v64_v42, %v1917_v7  ;;  %v95_v48 = vmax.f32 %v79_v40, 1.0 }
   0xc   :  { %270 = vperm.xlu1 %1802, %v209_v13   ;;  %1809 = vrcp.f32 %v100_v37  ;;  %v73_v53 = vcvt.s32.f32 %v57_v36  ;;  %v80_v59 = vcvt.s32.f32 %v64_v42  ;;  %v221_v63 = vrot.slane %v58_v55, %v1917_v7  ;;  %v51_v37 = vld [vmem:[%s2545_s0 + $0x68] sm:$0xff] }
   0xd   :  { %1811 = vrcp.f32 %v101_v38  ;;  %v249_v3 = vrot.slane %v65_v61, %v1917_v7  ;;  %v74_v12 = vcvt.s32.f32 %v58_v55  ;;  %v81_v13 = vcvt.s32.f32 %v65_v61  ;;  %v67_v38 = vld [vmem:[%s2546_s1 + $0xd] sm:$0x1] }
   0xe   :  { %166 = vperm.xlu0 %1801, %v47_v17   ;;  %1813 = vrcp.f32 %v88_v39  ;;  %v89_v2 = vmax.f32 %v73_v53, 1.0  ;;  %v96_v6 = vmax.f32 %v80_v59, 1.0  ;;  %v50_v17 = vld [vmem:[%s2545_s0 + $0x60] sm:$0xff]  ;;  %v75_v31 = vcvt.s32.f32 %v59_v15  ;;  %v52_v53 = vld [vmem:[%s2545_s0 + $0x70] sm:$0xff] }
   0xf   :  { %1815 = vrcp.f32 %v94_v45  ;;  %v90_v16 = vmax.f32 %v74_v12, 1.0  ;;  %v82_v32 = vcvt.s32.f32 %v66_v18  ;;  %v257_v42 = vrot.slane %v67_v38, %v1917_v7  ;;  %v602_v59 = vld [vmem:[%s2547_s2] sm:$0xff]  ;;  %v609_v12 = vld [vmem:[%s2547_s2 + $0x38] sm:$0xff] }
  0x10   :  { %273 = vperm.xlu1 %1802, %v213_v19   ;;  %1817 = vrcp.f32 %v95_v48  ;;  %v225_v19 = vrot.slane %v59_v15, %v1917_v7  ;;  %v91_v36 = vmax.f32 %v75_v31, 1.0  ;;  %v612_v15 = vld [vmem:[%s2547_s2 + $0x50] sm:$0xff] }
  0x11   :  { %1819 = vrcp.f32 %v89_v2  ;;  %v604_v2 = vld [vmem:[%s2547_s2 + $0x10] sm:$0xff] }
  0x12   :  { %291 = vperm.xlu0 %1801, %v237_v22   ;;  %v1804_v44 = vpop.eup %1803  ;;  %1821 = vrcp.f32 %v96_v6  ;;  %v97_v22 = vmax.f32 %v81_v13, 1.0  ;;  %v607_v6 = vld [vmem:[%s2547_s2 + $0x28] sm:$0xff] }
  0x13   :  { %v1806_v47 = vpop.eup %1805  ;;  %v365_v49 = vrot.slane %v1804_v44, %v1917_v7  ;;  %1823 = vrcp.f32 %v90_v16 }
  0x14   :  { %294 = vperm.xlu1 %1802, %v241_v25   ;;  %v369_v50 = vrot.slane %v1806_v47, %v1917_v7  ;;  %v253_v25 = vrot.slane %v66_v18, %v1917_v7  ;;  %1825 = vrcp.f32 %v97_v22  ;;  %v733_v18 = vld [vmem:[%s2548_s3 + $0x8] sm:$0xff]  ;;  %v735_v22 = vld [vmem:[%s2548_s3 + $0x18] sm:$0xff] }
  0x15   :  { %v1982_v51 = vpop.eup %1807  ;;  %1827 = vrcp.f32 %v91_v36 }
  0x16   :  { %148 = vperm.xlu0 %1801, %v41_v35   ;;  %v1984_v52 = vpop.eup %1809  ;;  %v393_v56 = vrot.slane %v1982_v51, %v1917_v7  ;;  %v60_v35 = vld [vmem:[%s2546_s1 + $0x6] sm:$0x1]  ;;  %v613_v51 = vld [vmem:[%s2547_s2 + $0x58] sm:$0xff] }
  0x17   :  { %v1994_v57 = vpop.eup %1811  ;;  %v421_v58 = vrot.slane %v1984_v52, %v1917_v7  ;;  %v229_v39 = vrot.slane %v60_v35, %v1917_v7  ;;  %v76_v44 = vcvt.s32.f32 %v60_v35  ;;  %v614_v52 = vld [vmem:[%s2547_s2 + $0x60] sm:$0xff] }
  0x18   :  { %169 = vperm.xlu1 %1802, %v48_v41   ;;  %v425_v62 = vrot.slane %v1994_v57, %v1917_v7  ;;  %v1814_v1 = vpop.eup %1813  ;;  %v98_v41 = vmax.f32 %v82_v32, 1.0 }
  0x19   :  { %v1816_v5 = vpop.eup %1815  ;;  %v373_v8 = vrot.slane %v1814_v1, %v1917_v7  ;;  %v92_v48 = vmax.f32 %v76_v44, 1.0 }
  0x1a   :  { %276 = vperm.xlu0 %1801, %v217_v43   ;;  %v1818_v9 = vpop.eup %1817  ;;  %v397_v10 = vrot.slane %v1816_v5, %v1917_v7  ;;  %1829 = vrcp.f32 %v98_v41  ;;  %v606_v5 = vld [vmem:[%s2547_s2 + $0x20] sm:$0xff] }
  0x1b   :  { %v401_v11 = vrot.slane %v1818_v9, %v1917_v7  ;;  %v1820_v20 = vpop.eup %1819  ;;  %1831 = vrcp.f32 %v92_v48  ;;  %v1663_v9 = vpack.c.bf16 %v607_v6, %v606_v5 }
  0x1c   :  { %297 = vperm.xlu1 %1802, %v245_v46   ;;  %v1822_v26 = vpop.eup %1821  ;;  %v377_v28 = vrot.slane %v1820_v20, %v1917_v7  ;;  %v83_v46 = vcvt.s32.f32 %v67_v38 }
  0x1d   :  { %v405_v29 = vrot.slane %v1822_v26, %v1917_v7  ;;  %v1824_v40 = vpop.eup %1823  ;;  %v2135_v26 = vand.u32 127, %v134_v0 }
  0x1e   :  { %427 = vperm.xlu0 %1801, %v365_v49   ;;  %v1826_v43 = vpop.eup %1825  ;;  %v381_v45 = vrot.slane %v1824_v40, %v1917_v7  ;;  %v99_v49 = vmax.f32 %v83_v46, 1.0 }
  0x1f   :  { %v409_v47 = vrot.slane %v1826_v43, %v1917_v7 }
  0x20   :  { %431 = vperm.xlu1 %1802, %v369_v50   ;;  %v45_v50 = vld [vmem:[%s2545_s0 + $0x38] sm:$0xff]  ;;  %1833 = vrcp.f32 %v99_v49 }
  0x22   :  { %151 = vperm.xlu0 %1801, %v42_v54   ;;  %v1828_v54 = vpop.eup %1827 }
  0x23   :  { %v385_v61 = vrot.slane %v1828_v54, %v1917_v7 }
  0x24   :  { %172 = vperm.xlu1 %1802, %v49_v60   ;;  %v1830_v55 = vpop.eup %1829  ;;  %v603_v60 = vld [vmem:[%s2547_s2 + $0x8] sm:$0xff] }
  0x25   :  { %v413_v1 = vrot.slane %v1830_v55, %v1917_v7 }
  0x26   :  { %279 = vperm.xlu0 %1801, %v221_v63   ;;  %v1655_v63 = vpack.c.bf16 %v603_v60, %v602_v59 }
  0x28   :  { %300 = vperm.xlu1 %1802, %v249_v3   ;;  %1656 = vmatprep.subr.bf16.mxu0 %v1655_v63  ;;  %v1832_v3 = vpop.eup %1831 }
  0x29   :  { %1658 = vmatpush3.bf16.msra.mxu0 %v1655_v63 }
  0x2a   :  { %435 = vperm.xlu0 %1801, %v373_v8   ;;  %v389_v8 = vrot.slane %v1832_v3, %v1917_v7 }
  0x2c   :  { %459 = vperm.xlu1 %1802, %v397_v10  }
  0x2e   :  { %463 = vperm.xlu0 %1801, %v401_v11   ;;  %v608_v11 = vld [vmem:[%s2547_s2 + $0x30] sm:$0xff] }
  0x2f   :  { %v1667_v13 = vpack.c.bf16 %v609_v12, %v608_v11 }
  0x30   :  { %154 = vperm.xlu1 %1802, %v43_v14  }
  0x32   :  { %175 = vperm.xlu0 %1801, %v50_v17   ;;  %v732_v17 = vld [vmem:[%s2548_s3] sm:$0xff] }
  0x33   :  { %v1687_v20 = vpack.c.bf16 %v733_v18, %v732_v17 }
  0x34   :  { %282 = vperm.xlu1 %1802, %v225_v19   ;;  %v734_v19 = vld [vmem:[%s2548_s3 + $0x10] sm:$0xff] }
  0x35   :  { %1688 = vmatprep.subr.bf16.mxu1 %v1687_v20 }
  0x36   :  { %303 = vperm.xlu0 %1801, %v253_v25   ;;  %v1691_v25 = vpack.c.bf16 %v735_v22, %v734_v19  ;;  %1690 = vmatpush3.bf16.msra.mxu1 %v1687_v20 }
  0x38   :  { %439 = vperm.xlu1 %1802, %v377_v28   ;;  %1692 = vmatprep.subr.bf16.mxu1 %v1691_v25 }
  0x3a   :  { %467 = vperm.xlu0 %1801, %v405_v29   ;;  %1694 = vmatpush3.bf16.msra.mxu1 %v1691_v25 }
  0x3c   :  { %157 = vperm.xlu1 %1802, %v44_v34  }
  0x3e   :  { %178 = vperm.xlu0 %1801, %v51_v37  }
  0x40   :  { %285 = vperm.xlu1 %1802, %v229_v39  }
  0x42   :  { %306 = vperm.xlu0 %1801, %v257_v42  }
  0x44   :  { %443 = vperm.xlu1 %1802, %v381_v45  }
  0x46   :  { %471 = vperm.xlu0 %1801, %v409_v47  }
  0x48   :  { %160 = vperm.xlu1 %1802, %v45_v50  }
  0x4a   :  { %181 = vperm.xlu0 %1801, %v52_v53  }
  0x4c   :  { %288 = vperm.xlu1 %1802, %v233_v27   ;;  %v1659_v27 = vpack.c.bf16 %v605_v21, %v604_v2 }
  0x4e   :  { %309 = vperm.xlu0 %1801, %v261_v30   ;;  %1660 = vmatprep.subr.bf16.mxu0 %v1659_v27  ;;  %v1834_v30 = vpop.eup %1833 }
  0x4f   :  { %1662 = vmatpush3.bf16.msra.mxu0 %v1659_v27  ;;  %v417_v10 = vrot.slane %v1834_v30, %v1917_v7  ;;  %v615_v7 = vld [vmem:[%s2547_s2 + $0x68] sm:$0xff] }
  0x50   :  { %447 = vperm.xlu1 %1802, %v385_v61   ;;  %1664 = vmatprep.subr.bf16.mxu0 %v1663_v9  ;;  %v1679_v57 = vpack.c.bf16 %v615_v7, %v614_v52 }
  0x52   :  { %475 = vperm.xlu0 %1801, %v413_v1  }
  0x53   :  { %1666 = vmatpush3.bf16.msra.mxu0 %v1663_v9 }
  0x54   :  { %184 = vperm.xlu1 %1802, %v53_v23   ;;  %1668 = vmatprep.subr.bf16.mxu0 %v1667_v13 }
  0x56   :  { %312 = vperm.xlu0 %1801, %v265_v33   ;;  %v611_v33 = vld [vmem:[%s2547_s2 + $0x48] sm:$0xff] }
  0x57   :  { %1670 = vmatpush3.bf16.msra.mxu0 %v1667_v13  ;;  %v1671_v14 = vpack.c.bf16 %v611_v33, %v610_v24 }
  0x58   :  { %451 = vperm.xlu1 %1802, %v389_v8  }
  0x59   :  { %1672 = vmatprep.subr.bf16.mxu0 %v1671_v14 }
  0x5a   :  { %479 = vperm.xlu0 %1801, %v417_v10  }
  0x5b   :  { %1674 = vmatpush3.bf16.msra.mxu0 %v1671_v14 }
  0x5c   :  { %455 = vperm.xlu1 %1802, %v393_v56   ;;  %v1675_v56 = vpack.c.bf16 %v613_v51, %v612_v15 }
  0x5e   :  { %483 = vperm.xlu0 %1801, %v421_v58   ;;  %1676 = vmatprep.subr.bf16.mxu0 %v1675_v56  ;;  %v616_v58 = vld [vmem:[%s2547_s2 + $0x70] sm:$0xff] }
  0x5f   :  { %1678 = vmatpush3.bf16.msra.mxu0 %v1675_v56 }
  0x60   :  { %487 = vperm.xlu1 %1802, %v425_v62   ;;  %1680 = vmatprep.subr.bf16.mxu0 %v1679_v57  ;;  %v617_v62 = vld [vmem:[%s2547_s2 + $0x78] sm:$0xff] }
  0x61   :  { %v1683_v16 = vpack.c.bf16 %v617_v62, %v616_v58 }
  0x63   :  { %1682 = vmatpush3.bf16.msra.mxu0 %v1679_v57 }
  0x64   :  { %1684 = vmatprep.subr.bf16.mxu0 %v1683_v16 }
  0x67   :  { %1686 = vmatpush3.bf16.msra.mxu0 %v1683_v16 }
  0x81   :  { %v140_v28 = vpop.permute.xlu0 %139 }
  0x82   :  { %v164_v29 = vpop.permute.xlu1 %163  ;;  %vm186_vm0 = vcmp.eq.s32.totalorder %v2135_v26, %v140_v28 }
  0x83   :  { %vm194_vm1 = vcmp.eq.s32.totalorder %v2135_v26, %v164_v29 }
  0x85   :  { %v143_v31 = vpop.permute.xlu0 %142 }
  0x86   :  { %vm187_vm2 = vcmp.eq.s32.totalorder %v2135_v26, %v143_v31 }
  0x87   :  { %v268_v32 = vpop.permute.xlu1 %267 }
  0x88   :  { %vm314_vm3 = vcmp.lt.s32.totalorder %v1908_v4, %v268_v32 }
  0x89   :  { %v146_v34 = vpop.permute.xlu0 %145  ;;  %vm2141_vm4 = vmand %vm186_vm0, %vm314_vm3  ;;  %vm634_vm0 = vcmask 1041409  }
  0x8a   :  { %vm188_vm5 = vcmp.eq.s32.totalorder %v2135_v26, %v146_v34 }
  0x8b   :  { %v271_v0 = vpop.permute.xlu1 %270 }
  0x8c   :  { %vm315_vm6 = vcmp.lt.s32.totalorder %v1908_v4, %v271_v0 }
  0x8d   :  { %v167_v36 = vpop.permute.xlu0 %166  ;;  %vm2147_vm7 = vmand %vm187_vm2, %vm315_vm6  ;;  %vm636_vm2 = vcmask 1042434  }
  0x8e   :  { %vm195_vm8 = vcmp.eq.s32.totalorder %v2135_v26, %v167_v36 }
  0x8f   :  { %v274_v38 = vpop.permute.xlu1 %273 }
  0x90   :  { %vm316_vm9 = vcmp.lt.s32.totalorder %v1908_v4, %v274_v38 }
  0x91   :  { %v292_v39 = vpop.permute.xlu0 %291  ;;  %vm2153_vm10 = vmand %vm188_vm5, %vm316_vm9 }
  0x92   :  { %vm322_vm11 = vcmp.lt.s32.totalorder %v1908_v4, %v292_v39 }
  0x93   :  { %v295_v41 = vpop.permute.xlu1 %294  ;;  %vm2160_vm12 = vmand %vm194_vm1, %vm322_vm11 }
  0x94   :  { %vm323_vm13 = vcmp.lt.s32.totalorder %v1908_v4, %v295_v41 }
  0x95   :  { %v149_v43 = vpop.permute.xlu0 %148  ;;  %vm2165_vm14 = vmand %vm195_vm8, %vm323_vm13 }
  0x96   :  { %vm189_vm3 = vcmp.eq.s32.totalorder %v2135_v26, %v149_v43 }
  0x97   :  { %v2169_v45 = vpop.permute.xlu1 %169 }
  0x98   :  { %vm196_vm15 = vcmp.eq.s32.totalorder %v2135_v26, %v2169_v45 }
  0x99   :  { %v277_v46 = vpop.permute.xlu0 %276 }
  0x9a   :  { %vm317_vm1 = vcmp.lt.s32.totalorder %v1908_v4, %v277_v46 }
  0x9b   :  { %v298_v47 = vpop.permute.xlu1 %297  ;;  %vm333_vm5 = vmand %vm189_vm3, %vm317_vm1  ;;  %vm640_vm1 = vcmask 1044484  }
  0x9d   :  { %v428_v48 = vpop.permute.xlu0 %427 }
  0x9e   :  { %v490_v49 = vsel %vm2141_vm4, %v428_v48, 0.0  ;;  %vm324_vm4 = vcmp.lt.s32.totalorder %v1908_v4, %v298_v47 }
  0x9f   :  { %v506_v50 = vrot.slane %v490_v49, 4  ;;  %v432_v53 = vpop.permute.xlu1 %431  ;;  %vm340_vm6 = vmand %vm196_vm15, %vm324_vm4 }
  0xa0   :  { %v491_v54 = vsel %vm2147_vm7, %v432_v53, 0.0 }
  0xa1   :  { %v507_v55 = vadd.f32 %v506_v50, %v490_v49  ;;  %v512_v59 = vrot.slane %v491_v54, 4  ;;  %v2177_v60 = vpop.permute.xlu0 %151 }
  0xa2   :  { %vm190_vm8 = vcmp.eq.s32.totalorder %v2135_v26, %v2177_v60 }
  0xa3   :  { %v508_v61 = vrot.slane %v507_v55, 2  ;;  %v513_v63 = vadd.f32 %v512_v59, %v491_v54  ;;  %v2179_v1 = vpop.permute.xlu1 %172 }
  0xa5   :  { %v509_v2 = vadd.f32 %v508_v61, %v507_v55  ;;  %v514_v21 = vrot.slane %v513_v63, 2  ;;  %v2181_v27 = vpop.permute.xlu0 %279 }
  0xa6   :  { %vm318_vm7 = vcmp.lt.s32.totalorder %v1908_v4, %v2181_v27 }
  0xa7   :  { %v510_v3 = vrot.slane %v509_v2, 1  ;;  %v515_v23 = vadd.f32 %v514_v21, %v513_v63  ;;  %v2183_v30 = vpop.permute.xlu1 %300  ;;  %vm334_vm11 = vmand %vm190_vm8, %vm318_vm7 }
  0xa8   :  { %vm325_vm9 = vcmp.lt.s32.totalorder %v1908_v4, %v2183_v30 }
  0xa9   :  { %v516_v5 = vrot.slane %v515_v23, 1  ;;  %v436_v6 = vpop.permute.xlu0 %435  ;;  %v511_v9 = vadd.f32 %v510_v3, %v509_v2 }
  0xaa   :  { %v492_v8 = vsel %vm2153_vm10, %v436_v6, 0.0  ;;  %vm638_vm10 = vcmask 1043459  }
  0xab   :  { %v517_v10 = vadd.f32 %v516_v5, %v515_v23  ;;  %v518_v11 = vrot.slane %v492_v8, 4  ;;  %v460_v12 = vpop.permute.xlu1 %459 }
  0xac   :  { %v498_v13 = vsel %vm2160_vm12, %v460_v12, 0.0  ;;  %vm197_vm12 = vcmp.eq.s32.totalorder %v2135_v26, %v2179_v1 }
  0xad   :  { %v635_v24 = vsel %vm634_vm0, %v517_v10, %v511_v9  ;;  %v519_v33 = vadd.f32 %v518_v11, %v492_v8  ;;  %v554_v14 = vrot.slane %v498_v13, 4  ;;  %v464_v15 = vpop.permute.xlu0 %463  ;;  %vm341_vm13 = vmand %vm197_vm12, %vm325_vm9 }
  0xae   :  { %v499_v51 = vsel %vm2165_vm14, %v464_v15, 0.0 }
  0xaf   :  { %v520_v56 = vrot.slane %v519_v33, 2  ;;  %v555_v52 = vadd.f32 %v554_v14, %v498_v13  ;;  %v560_v7 = vrot.slane %v499_v51, 4  ;;  %v2192_v57 = vpop.permute.xlu1 %154 }
  0xb0   :  { %vm191_vm15 = vcmp.eq.s32.totalorder %v2135_v26, %v2192_v57 }
  0xb1   :  { %v521_v58 = vadd.f32 %v520_v56, %v519_v33  ;;  %v556_v62 = vrot.slane %v555_v52, 2  ;;  %v561_v16 = vadd.f32 %v560_v7, %v499_v51  ;;  %v2194_v17 = vpop.permute.xlu0 %175 }
  0xb2   :  { %vm198_vm3 = vcmp.eq.s32.totalorder %v2135_v26, %v2194_v17 }
  0xb3   :  { %v522_v18 = vrot.slane %v521_v58, 1  ;;  %v557_v19 = vadd.f32 %v556_v62, %v555_v52  ;;  %v562_v20 = vrot.slane %v561_v16, 2  ;;  %v2196_v22 = vpop.permute.xlu1 %282 }
  0xb4   :  { %vm319_vm14 = vcmp.lt.s32.totalorder %v1908_v4, %v2196_v22 }
  0xb5   :  { %v523_v25 = vadd.f32 %v522_v18, %v521_v58  ;;  %v558_v28 = vrot.slane %v557_v19, 1  ;;  %v563_v29 = vadd.f32 %v562_v20, %v561_v16  ;;  %v2199_v31 = vpop.permute.xlu0 %303 }
  0xb7   :  { %v637_v32 = vsel %vm636_vm2, %v523_v25, %v635_v24  ;;  %v564_v34 = vrot.slane %v563_v29, 1  ;;  %v440_v35 = vpop.permute.xlu1 %439  ;;  %v559_v36 = vadd.f32 %v558_v28, %v557_v19 }
  0xb8   :  { %v493_v0 = vsel %vm333_vm5, %v440_v35, 0.0 }
  0xb9   :  { %v565_v37 = vadd.f32 %v564_v34, %v563_v29  ;;  %v524_v38 = vrot.slane %v493_v0, 4  ;;  %v468_v39 = vpop.permute.xlu0 %467 }
  0xba   :  { %v500_v40 = vsel %vm340_vm6, %v468_v39, 0.0 }
  0xbb   :  { %v648_v41 = vsel %vm634_vm0, %v565_v37, %v559_v36  ;;  %v525_v42 = vadd.f32 %v524_v38, %v493_v0  ;;  %v566_v43 = vrot.slane %v500_v40, 4  ;;  %v2208_v44 = vpop.permute.xlu1 %157  ;;  %vm326_vm0 = vcmp.lt.s32.totalorder %v1908_v4, %v2199_v31 }
  0xbc   :  { %vm342_vm4 = vmand %vm198_vm3, %vm326_vm0  ;;  %vm192_vm6 = vcmp.eq.s32.totalorder %v2135_v26, %v2208_v44 }
  0xbd   :  { %v526_v46 = vrot.slane %v525_v42, 2  ;;  %v567_v47 = vadd.f32 %v566_v43, %v500_v40  ;;  %v2210_v48 = vpop.permute.xlu0 %178 }
  0xbe   :  { %vm199_vm9 = vcmp.eq.s32.totalorder %v2135_v26, %v2210_v48 }
  0xbf   :  { %v527_v49 = vadd.f32 %v526_v46, %v525_v42  ;;  %v568_v50 = vrot.slane %v567_v47, 2  ;;  %v286_v53 = vpop.permute.xlu1 %285 }
  0xc0   :  { %vm320_vm5 = vcmp.lt.s32.totalorder %v1908_v4, %v286_v53 }
  0xc1   :  { %v528_v45 = vrot.slane %v527_v49, 1  ;;  %v569_v54 = vadd.f32 %v568_v50, %v567_v47  ;;  %v2214_v55 = vpop.permute.xlu0 %306  ;;  %vm336_vm8 = vmand %vm192_vm6, %vm320_vm5  ;;  %vm644_vm6 = vcmask 1046534  }
  0xc2   :  { %vm327_vm7 = vcmp.lt.s32.totalorder %v1908_v4, %v2214_v55 }
  0xc3   :  { %v529_v59 = vadd.f32 %v528_v45, %v527_v49  ;;  %v570_v61 = vrot.slane %v569_v54, 1  ;;  %v444_v63 = vpop.permute.xlu1 %443 }
  0xc4   :  { %v494_v2 = vsel %vm334_vm11, %v444_v63, 0.0  ;;  %vm343_vm11 = vmand %vm199_vm9, %vm327_vm7  ;;  %vm646_vm7 = vcmask 1047559  }
  0xc5   :  { %v571_v21 = vadd.f32 %v570_v61, %v569_v54  ;;  %v530_v27 = vrot.slane %v494_v2, 4  ;;  %v472_v3 = vpop.permute.xlu0 %471  ;;  %v639_v23 = vsel %vm638_vm10, %v529_v59, %v637_v32 }
  0xc6   :  { %v501_v5 = vsel %vm341_vm13, %v472_v3, 0.0 }
  0xc7   :  { %v649_v60 = vsel %vm636_vm2, %v571_v21, %v648_v41  ;;  %v531_v6 = vadd.f32 %v530_v27, %v494_v2  ;;  %v572_v30 = vrot.slane %v501_v5, 4  ;;  %v161_v8 = vpop.permute.xlu1 %160  ;;  %vm335_vm2 = vmand %vm191_vm15, %vm319_vm14  ;;  %vm642_vm14 = vcmask 1045509  }
  0xc8   :  { %vm193_vm12 = vcmp.eq.s32.totalorder %v2135_v26, %v161_v8 }
  0xc9   :  { %v532_v9 = vrot.slane %v531_v6, 2  ;;  %v573_v10 = vadd.f32 %v572_v30, %v501_v5  ;;  %v182_v11 = vpop.permute.xlu0 %181 }
  0xca   :  { %vm200_vm0 = vcmp.eq.s32.totalorder %v2135_v26, %v182_v11 }
  0xcb   :  { %v533_v12 = vadd.f32 %v532_v9, %v531_v6  ;;  %v574_v13 = vrot.slane %v573_v10, 2  ;;  %v289_v24 = vpop.permute.xlu1 %288 }
  0xcd   :  { %v534_v1 = vrot.slane %v533_v12, 1  ;;  %v575_v33 = vadd.f32 %v574_v13, %v573_v10  ;;  %v310_v14 = vpop.permute.xlu0 %309 }
  0xce   :  { %vm328_vm13 = vcmp.lt.s32.totalorder %v1908_v4, %v310_v14 }
  0xcf   :  { %v535_v15 = vadd.f32 %v534_v1, %v533_v12  ;;  %v576_v51 = vrot.slane %v575_v33, 1  ;;  %v448_v56 = vpop.permute.xlu1 %447  ;;  %vm344_vm3 = vmand %vm200_vm0, %vm328_vm13 }
  0xd0   :  { %v495_v52 = vsel %vm335_vm2, %v448_v56, 0.0 }
  0xd1   :  { %v577_v7 = vadd.f32 %v576_v51, %v575_v33  ;;  %v536_v58 = vrot.slane %v495_v52, 4  ;;  %v476_v62 = vpop.permute.xlu0 %475  ;;  %v641_v16 = vsel %vm640_vm1, %v535_v15, %v639_v23 }
  0xd2   :  { %v502_v18 = vsel %vm342_vm4, %v476_v62, 0.0  ;;  %v1838_v62 = vmov 0.0|0.0  }
  0xd3   :  { %v650_v57 = vsel %vm638_vm10, %v577_v7, %v649_v60  ;;  %v537_v19 = vadd.f32 %v536_v58, %v495_v52  ;;  %v578_v20 = vrot.slane %v502_v18, 4  ;;  %v185_v22 = vpop.permute.xlu1 %184  ;;  %vm321_vm10 = vcmp.lt.s32.totalorder %v1908_v4, %v289_v24  ;;  %1695 = vmatprep.subr.bf16.mxu1 %v1838_v62  ;;  %1719 = vmatprep.subr.bf16.mxu0 %v1838_v62 }
  0xd4   :  { %vm337_vm15 = vmand %vm193_vm12, %vm321_vm10  ;;  %vm201_vm4 = vcmp.eq.s32.totalorder %v2135_v26, %v185_v22 }
  0xd5   :  { %v538_v25 = vrot.slane %v537_v19, 2  ;;  %v579_v28 = vadd.f32 %v578_v20, %v502_v18  ;;  %v313_v29 = vpop.permute.xlu0 %312  ;;  %v829_v18 = vld [vmem:[%s2549_s5 + $0x8] sm:$0xff]  ;;  %v831_v20 = vld [vmem:[%s2549_s5 + $0x18] sm:$0xff] }
  0xd6   :  { %vm329_vm2 = vcmp.lt.s32.totalorder %v1908_v4, %v313_v29 }
  0xd7   :  { %v539_v17 = vadd.f32 %v538_v25, %v537_v19  ;;  %v580_v31 = vrot.slane %v579_v28, 2  ;;  %v452_v32 = vpop.permute.xlu1 %451  ;;  %vm345_vm5 = vmand %vm201_vm4, %vm329_vm2  ;;  %v830_v19 = vld [vmem:[%s2549_s5 + $0x10] sm:$0xff]  ;;  %v832_v25 = vld [vmem:[%s2549_s5 + $0x20] sm:$0xff] }
  0xd8   :  { %v496_v34 = vsel %vm336_vm8, %v452_v32, 0.0  ;;  %v1723_v22 = vpack.c.bf16 %v831_v20, %v830_v19  ;;  %vm1839_vm8 = vmmov 0  }
  0xd9   :  { %v540_v35 = vrot.slane %v539_v17, 1  ;;  %v581_v0 = vadd.f32 %v580_v31, %v579_v28  ;;  %v542_v36 = vrot.slane %v496_v34, 4  ;;  %v480_v37 = vpop.permute.xlu0 %479  ;;  %v833_v28 = vld [vmem:[%s2549_s5 + $0x28] sm:$0xff]  ;;  %v835_v31 = vld [vmem:[%s2549_s5 + $0x38] sm:$0xff] }
  0xda   :  { %v503_v38 = vsel %vm343_vm11, %v480_v37, 0.0  ;;  %v1726_v29 = vpack.c.bf16 %v833_v28, %v832_v25  ;;  %v839_v37 = vld [vmem:[%s2549_s5 + $0x58] sm:$0xff]  ;;  %v1328_v28 = vld [vmem:[%s2549_s5 + $0x120] sm:$0xff] }
  0xdb   :  { %v541_v39 = vadd.f32 %v540_v35, %v539_v17  ;;  %v582_v40 = vrot.slane %v581_v0, 1  ;;  %v543_v41 = vadd.f32 %v542_v36, %v496_v34  ;;  %v584_v42 = vrot.slane %v503_v38, 4  ;;  %v456_v43 = vpop.permute.xlu1 %455  ;;  %v834_v17 = vld [vmem:[%s2549_s5 + $0x30] sm:$0xff]  ;;  %v836_v34 = vld [vmem:[%s2549_s5 + $0x40] sm:$0xff]  ;;  %v837_v35 = vld [vmem:[%s2549_s5 + $0x48] sm:$0xff] }
  0xdc   :  { %v497_v44 = vsel %vm337_vm15, %v456_v43, 0.0  ;;  %v1729_v32 = vpack.c.bf16 %v835_v31, %v834_v17  ;;  %v838_v36 = vld [vmem:[%s2549_s5 + $0x50] sm:$0xff]  ;;  %v1309_v43 = vld [vmem:[%s2549_s5 + $0x88] sm:$0xff]  ;;  %v1344_v17 = vld [vmem:[%s2549_s5 + $0x1a0] sm:$0xff] }
  0xdd   :  { %v583_v46 = vadd.f32 %v582_v40, %v581_v0  ;;  %v544_v47 = vrot.slane %v543_v41, 2  ;;  %v585_v48 = vadd.f32 %v584_v42, %v503_v38  ;;  %v548_v49 = vrot.slane %v497_v44, 4  ;;  %v484_v50 = vpop.permute.xlu0 %483  ;;  %v841_v40 = vld [vmem:[%s2549_s5 + $0x68] sm:$0xff]  ;;  %v1308_v42 = vld [vmem:[%s2549_s5 + $0x80] sm:$0xff] }
  0xde   :  { %v504_v53 = vsel %vm344_vm3, %v484_v50, 0.0  ;;  %v643_v45 = vsel %vm642_vm14, %v541_v39, %v641_v16  ;;  %v828_v16 = vld [vmem:[%s2549_s5] sm:$0xff]  ;;  %v1732_v0 = vpack.c.bf16 %v837_v35, %v836_v34  ;;  %v1735_v38 = vpack.c.bf16 %v839_v37, %v838_v36  ;;  %v1345_v31 = vld [vmem:[%s2549_s5 + $0x1a8] sm:$0xff]  ;;  %v1330_v35 = vld [vmem:[%s2549_s5 + $0x130] sm:$0xff] }
  0xdf   :  { %v545_v54 = vadd.f32 %v544_v47, %v543_v41  ;;  %v586_v55 = vrot.slane %v585_v48, 2  ;;  %v549_v59 = vadd.f32 %v548_v49, %v497_v44  ;;  %v590_v61 = vrot.slane %v504_v53, 4  ;;  %v488_v63 = vpop.permute.xlu1 %487  ;;  %v840_v39 = vld [vmem:[%s2549_s5 + $0x60] sm:$0xff]  ;;  %v1311_v49 = vld [vmem:[%s2549_s5 + $0x98] sm:$0xff]  ;;  %v1346_v36 = vld [vmem:[%s2549_s5 + $0x1b0] sm:$0xff] }
  0xe0   :  { %v505_v2 = vsel %vm345_vm5, %v488_v63, 0.0  ;;  %v651_v21 = vsel %vm640_vm1, %v583_v46, %v650_v57  ;;  %v1720_v57 = vpack.c.bf16 %v829_v18, %v828_v16  ;;  %v1738_v41 = vpack.c.bf16 %v841_v40, %v840_v39  ;;  %v1316_v63 = vld [vmem:[%s2549_s5 + $0xc0] sm:$0xff]  ;;  %v1342_v18 = vld [vmem:[%s2549_s5 + $0x190] sm:$0xff]  ;;  %v1347_v37 = vld [vmem:[%s2549_s5 + $0x1b8] sm:$0xff] }
  0xe1   :  { %v546_v27 = vrot.slane %v545_v54, 1  ;;  %v587_v3 = vadd.f32 %v586_v55, %v585_v48  ;;  %v550_v23 = vrot.slane %v549_v59, 2  ;;  %v591_v5 = vadd.f32 %v590_v61, %v504_v53  ;;  %v1310_v48 = vld [vmem:[%s2549_s5 + $0x90] sm:$0xff]  ;;  %v1312_v53 = vld [vmem:[%s2549_s5 + $0xa0] sm:$0xff] }
  0xe2   :  { %v596_v60 = vrot.slane %v505_v2, 4  ;;  %vm743_vm1 = vcmask 261120   ;;  %v1696_v46 = vpack.c.bf16 %v1309_v43, %v1308_v42  ;;  %v1699_v50 = vpack.c.bf16 %v1311_v49, %v1310_v48  ;;  %v1314_v55 = vld [vmem:[%s2549_s5 + $0xb0] sm:$0xff]  ;;  %v1332_v40 = vld [vmem:[%s2549_s5 + $0x140] sm:$0xff]  ;;  %v1349_v43 = vld [vmem:[%s2549_s5 + $0x1c8] sm:$0xff] }
  0xe3   :  { %v547_v26 = vadd.f32 %v546_v27, %v545_v54  ;;  %v588_v6 = vrot.slane %v587_v3, 1  ;;  %v551_v30 = vadd.f32 %v550_v23, %v549_v59  ;;  %v592_v8 = vrot.slane %v591_v5, 2  ;;  %v1315_v59 = vld [vmem:[%s2549_s5 + $0xb8] sm:$0xff]  ;;  %v1318_v27 = vld [vmem:[%s2549_s5 + $0xd0] sm:$0xff]  ;;  %v1348_v42 = vld [vmem:[%s2549_s5 + $0x1c0] sm:$0xff] }
  0xe4   :  { %v597_v9 = vadd.f32 %v596_v60, %v505_v2  ;;  %v1705_v61 = vpack.c.bf16 %v1315_v59, %v1314_v55  ;;  %v1317_v2 = vld [vmem:[%s2549_s5 + $0xc8] sm:$0xff]  ;;  %v1774_v34 = vpack.c.bf16 %v1345_v31, %v1344_v17  ;;  %v1777_v39 = vpack.c.bf16 %v1347_v37, %v1346_v36  ;;  %v1335_v48 = vld [vmem:[%s2549_s5 + $0x158] sm:$0xff]  ;;  %v1350_v49 = vld [vmem:[%s2549_s5 + $0x1d0] sm:$0xff] }
  0xe5   :  { %v589_v10 = vadd.f32 %v588_v6, %v587_v3  ;;  %v552_v11 = vrot.slane %v551_v30, 1  ;;  %v593_v12 = vadd.f32 %v592_v8, %v591_v5  ;;  %v645_v4 = vsel %vm644_vm6, %v547_v26, %v643_v45  ;;  %v1313_v45 = vld [vmem:[%s2549_s5 + $0xa8] sm:$0xff]  ;;  %v1319_v3 = vld [vmem:[%s2549_s5 + $0xd8] sm:$0xff]  ;;  %v1320_v5 = vld [vmem:[%s2549_s5 + $0xe0] sm:$0xff] }
  0xe6   :  { %v598_v13 = vrot.slane %v597_v9, 2  ;;  %v1702_v54 = vpack.c.bf16 %v1313_v45, %v1312_v53  ;;  %v1711_v23 = vpack.c.bf16 %v1319_v3, %v1318_v27  ;;  %v1321_v60 = vld [vmem:[%s2549_s5 + $0xe8] sm:$0xff]  ;;  %v1322_v6 = vld [vmem:[%s2549_s5 + $0xf0] sm:$0xff]  ;;  %v1352_v59 = vld [vmem:[%s2549_s5 + $0x1e0] sm:$0xff] }
  0xe7   :  { %v594_v24 = vrot.slane %v593_v12, 1  ;;  %v553_v1 = vadd.f32 %v552_v11, %v551_v30  ;;  %v652_v33 = vsel %vm642_vm14, %v589_v10, %v651_v21  ;;  %v1708_v21 = vpack.c.bf16 %v1317_v2, %v1316_v63  ;;  %v1323_v30 = vld [vmem:[%s2549_s5 + $0xf8] sm:$0xff]  ;;  %v1337_v55 = vld [vmem:[%s2549_s5 + $0x168] sm:$0xff]  ;;  %v1354_v3 = vld [vmem:[%s2549_s5 + $0x1f0] sm:$0xff] }
  0xe8   :  { %v599_v14 = vadd.f32 %v598_v13, %v597_v9  ;;  %v1714_v26 = vpack.c.bf16 %v1321_v60, %v1320_v5  ;;  %v1717_v8 = vpack.c.bf16 %v1323_v30, %v1322_v6  ;;  %v842_v9 = vld [vmem:[%s2549_s5 + $0x70] sm:$0xff]  ;;  %v843_v10 = vld [vmem:[%s2549_s5 + $0x78] sm:$0xff]  ;;  %v1325_v13 = vld [vmem:[%s2549_s5 + $0x108] sm:$0xff] }
  0xe9   :  { %v595_v15 = vadd.f32 %v594_v24, %v593_v12  ;;  %v647_v51 = vsel %vm646_vm7, %v553_v1, %v645_v4  ;;  %v1741_v11 = vpack.c.bf16 %v843_v10, %v842_v9  ;;  %v1840_v12 = vmov 0.0   ;;  %v1324_v4 = vld [vmem:[%s2549_s5 + $0x100] sm:$0xff]  ;;  %v1339_v27 = vld [vmem:[%s2549_s5 + $0x178] sm:$0xff] }
  0xea   :  { %v600_v56 = vrot.slane %v599_v14, 1  ;;  %1490 = vmatprep.mubr.f32.mxu0 %v647_v51  ;;  %v1305_v24 = vld [vmem:[%s2550_s4] ss:$0 sm:$0xff] }
  0xeb   :  { %v653_v52 = vsel %vm644_vm6, %v595_v15, %v652_v33  ;;  %v1340_v1 = vld [vmem:[%s2549_s5 + $0x180] sm:$0xff]  ;;  %v1341_v33 = vld [vmem:[%s2549_s5 + $0x188] sm:$0xff]  ;;  %v1744_v15 = vpack.c.bf16 %v1325_v13, %v1324_v4 }
  0xec   :  { %v601_v7 = vadd.f32 %v600_v56, %v599_v14  ;;  %v1357_v31 = vld [vmem:[%s2553_s7] ss:$0 sm:$0xff] }
  0xed   :  { %v1359_v36 = vld [vmem:[%s2555_s10] ss:$0 sm:$0xff] }
  0xee   :  { %v654_v58 = vsel %vm646_vm7, %v601_v7, %v653_v52  ;;  %v1768_v52 = vpack.c.bf16 %v1341_v33, %v1340_v1  ;;  %v1326_v7 = vld [vmem:[%s2549_s5 + $0x110] sm:$0xff]  ;;  %v1356_v33 = vld [vmem:[%s2551_s6] ss:$0 sm:$0xff] }
  0xef   :  { %1491 = vmatmul.mubr.f32.vlgmr.msra.gmra.mrb[0].mxu0 %v654_v58  ;;  %v1327_v58 = vld [vmem:[%s2549_s5 + $0x118] sm:$0xff] }
  0xf0   :  { %1721 = vmatpush3.bf16.msra.mxu0 %v1720_v57  ;;  %1571 = vmatprep.mubr.msk.f32.mxu0 %vm1839_vm8, %v1840_v12  ;;  %v1343_v57 = vld [vmem:[%s2549_s5 + $0x198] sm:$0xff] }
  0xf1   :  { %1722 = vmatprep.subr.bf16.mxu0 %v1838_v62  ;;  %v1771_v25 = vpack.c.bf16 %v1343_v57, %v1342_v18  ;;  %v1217_v18 = vld [vmem:[%s2552_s9 + $0x8] sm:$0xff] }
  0xf4   :  { %1724 = vmatpush3.bf16.msra.mxu0 %v1723_v22  ;;  %v1747_v22 = vpack.c.bf16 %v1327_v58, %v1326_v7 }
  0xf5   :  { %1725 = vmatprep.subr.bf16.mxu0 %v1838_v62 }
  0xf8   :  { %1727 = vmatpush3.bf16.msra.mxu0 %v1726_v29  ;;  %v1329_v29 = vld [vmem:[%s2549_s5 + $0x128] sm:$0xff] }
  0xf9   :  { %1728 = vmatprep.subr.bf16.mxu0 %v1838_v62 }
  0xfc   :  { %1730 = vmatpush3.bf16.msra.mxu0 %v1729_v32  ;;  %v1750_v32 = vpack.c.bf16 %v1329_v29, %v1328_v28 }
  0xfd   :  { %1731 = vmatprep.subr.bf16.mxu0 %v1838_v62 }
 0x100   :  { %1733 = vmatpush3.bf16.msra.mxu0 %v1732_v0  ;;  %v1331_v0 = vld [vmem:[%s2549_s5 + $0x138] sm:$0xff] }
 0x101   :  { %1734 = vmatprep.subr.bf16.mxu0 %v1838_v62 }
 0x104   :  { %1736 = vmatpush3.bf16.msra.mxu0 %v1735_v38  ;;  %v1753_v38 = vpack.c.bf16 %v1331_v0, %v1330_v35 }
 0x105   :  { %1737 = vmatprep.subr.bf16.mxu0 %v1838_v62 }
 0x108   :  { %1739 = vmatpush3.bf16.msra.mxu0 %v1738_v41  ;;  %v1333_v41 = vld [vmem:[%s2549_s5 + $0x148] sm:$0xff] }
 0x109   :  { %1740 = vmatprep.subr.bf16.mxu0 %v1838_v62 }
 0x10c   :  { %1742 = vmatpush3.bf16.msra.mxu0 %v1741_v11 }
 0x10d   :  { %1767 = vmatprep.subr.bf16.mxu0 %v1838_v62 }
 0x1c2   :  { %v1492_v44 = vpop.f32.mrb[0].mxu0 }
 0x1c3   :  { %v723_v47 = vpop.f32.mrb[1].mxu0 }
 0x1c4   :  { %1501 = vmatprep.mubr.msk.f32.mxu1 %vm743_vm1, %v723_v47  ;;  %v1334_v47 = vld [vmem:[%s2549_s5 + $0x150] sm:$0xff] }
 0x1c5   :  { %1502 = vmatmul.mubr.msk.f32.vlgmr.msra.gmra.mrb[0].mxu1 %vm743_vm1, %v1492_v44  ;;  %v1756_v44 = vpack.c.bf16 %v1333_v41, %v1332_v40  ;;  %v1759_v53 = vpack.c.bf16 %v1335_v48, %v1334_v47 }
 0x1c6   :  { %1697 = vmatpush3.bf16.msra.mxu1 %v1696_v46  ;;  %1536 = vmatprep.mubr.msk.f32.mxu1 %vm1839_vm8, %v1840_v12  ;;  %v1780_v46 = vpack.c.bf16 %v1349_v43, %v1348_v42 }
 0x1c7   :  { %1698 = vmatprep.subr.bf16.mxu1 %v1838_v62 }
 0x1ca   :  { %1700 = vmatpush3.bf16.msra.mxu1 %v1699_v50  ;;  %v1351_v50 = vld [vmem:[%s2549_s5 + $0x1d8] sm:$0xff] }
 0x1cb   :  { %1701 = vmatprep.subr.bf16.mxu1 %v1838_v62  ;;  %v1783_v45 = vpack.c.bf16 %v1351_v50, %v1350_v49 }
 0x1ce   :  { %1703 = vmatpush3.bf16.msra.mxu1 %v1702_v54  ;;  %v1336_v54 = vld [vmem:[%s2549_s5 + $0x160] sm:$0xff] }
 0x1cf   :  { %1704 = vmatprep.subr.bf16.mxu1 %v1838_v62  ;;  %v1762_v63 = vpack.c.bf16 %v1337_v55, %v1336_v54 }
 0x1d2   :  { %1706 = vmatpush3.bf16.msra.mxu1 %v1705_v61  ;;  %v1353_v61 = vld [vmem:[%s2549_s5 + $0x1e8] sm:$0xff] }
 0x1d3   :  { %1707 = vmatprep.subr.bf16.mxu1 %v1838_v62  ;;  %v1786_v2 = vpack.c.bf16 %v1353_v61, %v1352_v59 }
 0x1d6   :  { %1709 = vmatpush3.bf16.msra.mxu1 %v1708_v21  ;;  %v1338_v21 = vld [vmem:[%s2549_s5 + $0x170] sm:$0xff] }
 0x1d7   :  { %1710 = vmatprep.subr.bf16.mxu1 %v1838_v62  ;;  %v1765_v5 = vpack.c.bf16 %v1339_v27, %v1338_v21 }
 0x1da   :  { %1712 = vmatpush3.bf16.msra.mxu1 %v1711_v23  ;;  %v1355_v23 = vld [vmem:[%s2549_s5 + $0x1f8] sm:$0xff] }
 0x1db   :  { %1713 = vmatprep.subr.bf16.mxu1 %v1838_v62  ;;  %v1789_v60 = vpack.c.bf16 %v1355_v23, %v1354_v3 }
 0x1de   :  { %1715 = vmatpush3.bf16.msra.mxu1 %v1714_v26 }
 0x1df   :  { %1716 = vmatprep.subr.bf16.mxu1 %v1838_v62 }
 0x1e2   :  { %1718 = vmatpush3.bf16.msra.mxu1 %v1717_v8 }
 0x1e3   :  { %1743 = vmatprep.subr.bf16.mxu1 %v1838_v62 }
 0x298   :  { %v1503_v14 = vpop.f32.mrb[0].mxu1 }
 0x299   :  { %v2393_v51 = vadd.f32 %v1503_v14, %v1305_v24  ;;  %v816_v56 = vpop.f32.mrb[1].mxu1 }
 0x29a   :  { %v2401_v16 = vadd.f32 %v1305_v24, %v816_v56 }
 0x29b   :  { %1537 = vmatmul.mubr.f32.vlgmr.msra.gmra.mrb[2].mxu1 %v2393_v51 }
 0x29c   :  { %v825_v19 = vsub.f32 %v2401_v16, %v2393_v51  ;;  %v2414_v20 = vmul.f32 %v2393_v51, %v2401_v16  ;;  %1745 = vmatpush3.bf16.msra.mxu1 %v1744_v15  ;;  %1572 = vmatmul.mubr.f32.vlgmr.msra.gmra.mrb[2].mxu0 %v2401_v16  ;;  %v1216_v16 = vld [vmem:[%s2552_s9] sm:$0xff] }
 0x29d   :  { %1769 = vmatpush3.bf16.msra.mxu0 %v1768_v52  ;;  %1746 = vmatprep.subr.bf16.mxu1 %v1838_v62  ;;  %v1792_v57 = vpack.c.bf16 %v1217_v18, %v1216_v16 }
 0x29e   :  { %1770 = vmatprep.subr.bf16.mxu0 %v1838_v62  ;;  %1606 = vmatprep.mubr.msk.f32.mxu1 %vm1839_vm8, %v1840_v12  ;;  %v826_v26 = vand.u32 2147483647, %v825_v19  ;;  %v1218_v19 = vld [vmem:[%s2552_s9 + $0x10] sm:$0xff] }
 0x29f   :  { %1641 = vmatprep.mubr.msk.f32.mxu0 %vm1839_vm8, %v1840_v12 }
 0x2a0   :  { %1748 = vmatpush3.bf16.msra.mxu1 %v1747_v22 }
 0x2a1   :  { %1772 = vmatpush3.bf16.msra.mxu0 %v1771_v25  ;;  %1749 = vmatprep.subr.bf16.mxu1 %v1838_v62 }
 0x2a2   :  { %1773 = vmatprep.subr.bf16.mxu0 %v1838_v62 }
 0x2a4   :  { %1751 = vmatpush3.bf16.msra.mxu1 %v1750_v32  ;;  %v1358_v32 = vld [vmem:[%s2554_s8] ss:$0 sm:$0xff] }
 0x2a5   :  { %1775 = vmatpush3.bf16.msra.mxu0 %v1774_v34  ;;  %1752 = vmatprep.subr.bf16.mxu1 %v1838_v62 }
 0x2a6   :  { %1776 = vmatprep.subr.bf16.mxu0 %v1838_v62 }
 0x2a8   :  { %1754 = vmatpush3.bf16.msra.mxu1 %v1753_v38 }
 0x2a9   :  { %1778 = vmatpush3.bf16.msra.mxu0 %v1777_v39  ;;  %1755 = vmatprep.subr.bf16.mxu1 %v1838_v62 }
 0x2aa   :  { %1779 = vmatprep.subr.bf16.mxu0 %v1838_v62 }
 0x2ac   :  { %1757 = vmatpush3.bf16.msra.mxu1 %v1756_v44 }
 0x2ad   :  { %1781 = vmatpush3.bf16.msra.mxu0 %v1780_v46  ;;  %1758 = vmatprep.subr.bf16.mxu1 %v1838_v62 }
 0x2ae   :  { %1782 = vmatprep.subr.bf16.mxu0 %v1838_v62 }
 0x2b0   :  { %1760 = vmatpush3.bf16.msra.mxu1 %v1759_v53 }
 0x2b1   :  { %1784 = vmatpush3.bf16.msra.mxu0 %v1783_v45  ;;  %1761 = vmatprep.subr.bf16.mxu1 %v1838_v62 }
 0x2b2   :  { %1785 = vmatprep.subr.bf16.mxu0 %v1838_v62 }
 0x2b4   :  { %1763 = vmatpush3.bf16.msra.mxu1 %v1762_v63 }
 0x2b5   :  { %1787 = vmatpush3.bf16.msra.mxu0 %v1786_v2  ;;  %1764 = vmatprep.subr.bf16.mxu1 %v1838_v62 }
 0x2b6   :  { %1788 = vmatprep.subr.bf16.mxu0 %v1838_v62 }
 0x2b8   :  { %1766 = vmatpush3.bf16.msra.mxu1 %v1765_v5 }
 0x2b9   :  { %1790 = vmatpush3.bf16.msra.mxu0 %v1789_v60  ;;  %1791 = vmatprep.subr.bf16.mxu1 %v1838_v62 }
 0x2bb   :  { %1607 = vmatmul.mubr.f32.vlgmr.msra.gmra.mrb[4].mxu1 %v826_v26 }
 0x2bc   :  { %1642 = vmatmul.mubr.f32.vlgmr.msra.gmra.mrb[4].mxu0 %v2414_v20  ;;  %1652 = vmatprep.mubr.msk.f32.mxu1 %vm1839_vm8, %v1840_v12  ;;  %v1219_v20 = vld [vmem:[%s2552_s9 + $0x18] sm:$0xff] }
 0x2bd   :  { %1793 = vmatpush3.bf16.msra.mxu1 %v1792_v57  ;;  %v1795_v22 = vpack.c.bf16 %v1219_v20, %v1218_v19 }
 0x2be   :  { %1794 = vmatprep.subr.bf16.mxu1 %v1838_v62 }
 0x2c1   :  { %1796 = vmatpush3.bf16.msra.mxu1 %v1795_v22 }
 0x36e   :  { %v927_v6 = vpop.f32.mrb[2].mxu1 }
 0x36f   :  { %v1538_v30 = vpop.f32.mrb[3].mxu1  ;;  %v997_v8 = vpop.f32.mrb[2].mxu0 }
 0x370   :  { %v998_v9 = vadd.f32 %v997_v8, %v927_v6  ;;  %v1573_v10 = vpop.f32.mrb[3].mxu0 }
 0x38e   :  { %v1084_v11 = vpop.f32.mrb[4].mxu1 }
 0x38f   :  { %v1088_v4 = vadd.f32 %v1084_v11, %v998_v9  ;;  %v1608_v13 = vpop.f32.mrb[5].mxu1  ;;  %v1172_v24 = vpop.f32.mrb[4].mxu0 }
 0x390   :  { %v1643_v1 = vpop.f32.mrb[5].mxu0 }
 0x391   :  { %v1176_v14 = vadd.f32 %v1172_v24, %v1088_v4 }
 0x393   :  { %v1184_v15 = vadd.f32 %v1356_v33, %v1176_v14 }
 0x395   :  { %v1185_v51 = vsel %vm743_vm1, %v1184_v15, 0.0 }
 0x396   :  { %1186 = vadd.xlane.f32.xlu0 %v1185_v51 }
 0x423   :  { %v1187_v12 = vpop.xlane.xlu0 %1186 }
 0x424   :  { %v1189_v56 = vmul.f32 0.03125, %v1187_v12 }
 0x426   :  { %v1190_v52 = vsub.f32 %v1184_v15, %v1189_v56 }
 0x428   :  { %v1191_v7 = vmul.f32 %v1190_v52, %v1190_v52 }
 0x42a   :  { %v1192_v58 = vsel %vm743_vm1, %v1191_v7, 0.0 }
 0x42b   :  { %1193 = vadd.xlane.f32.xlu1 %v1192_v58 }
 0x4b8   :  { %v1194_v25 = vpop.xlane.xlu1 %1193 }
 0x4b9   :  { %v1195_v28 = vmul.f32 0.03125, %v1194_v25 }
 0x4bb   :  { %v1196_v29 = vadd.f32 1e-05, %v1195_v28 }
 0x4bd   :  { %1835 = vrsqrt.f32 %v1196_v29 }
 0x4c7   :  { %v1836_v17 = vpop.eup %1835 }
 0x4c8   :  { %v1198_v62 = vmul.f32 %v1836_v17, %v1190_v52 }
 0x4ca   :  { %v1206_v34 = vmul.f32 %v1357_v31, %v1198_v62 }
 0x4cc   :  { %v1214_v35 = vadd.f32 %v1358_v32, %v1206_v34 }
 0x4ce   :  { %v1215_v0 = vmax.f32 %v1214_v35, 0.0 }
 0x4d0   :  { %1653 = vmatmul.mubr.msk.f32.vlgmr.msra.gmra.mrb[6].mxu1 %vm743_vm1, %v1215_v0 }
 0x5a3   :  { %v1296_v37 = vpop.f32.mrb[6].mxu1 }
 0x5a4   :  { %v1297_v38 = vadd.f32 %v1359_v36, %v1296_v37  ;;  %v1654_v39 = vpop.f32.mrb[7].mxu1 }
 0x5a6   :  { %1300 = vst [vmem:[%s2556_s11] sm:$0xff] %v1297_v38 }

</bundles_post_ra>
